<compile_context>
chip_gen: v5e
topology: v5e:2x2
jax: 0.10.0
libtpu: 0.0.40
codegen_flags: <defaults>
</compile_context>

<pallas_src>
import numpy as np

import jax
import jax.numpy as jnp
from jax.experimental import pallas as pl
from jax.experimental.pallas import tpu as pltpu


# --------------------------- in-kernel building blocks ---------------------------

def _band_matrices(n):
  """(n, n) smoothing [1,2,1] and difference [1,0,-1] band matrices.

  Built from iota inside the kernel (a handful of VPU ops, once per step).
  Zero padding of the 3x3 conv is encoded exactly: out-of-range taps simply
  have no entry in the band.
  """
  r = jax.lax.broadcasted_iota(jnp.int32, (n, n), 0)
  c = jax.lax.broadcasted_iota(jnp.int32, (n, n), 1)
  d = r - c
  smooth = jnp.where(d == 0, 2.0, 0.0) + jnp.where(jnp.abs(d) == 1, 1.0, 0.0)
  diff = jnp.where(d == 1, 1.0, 0.0) - jnp.where(d == -1, 1.0, 0.0)
  return smooth.astype(jnp.float32), diff.astype(jnp.float32)


def _bmm(a, b):
  """Batched matmul (B, m, k) @ (B, k, n) -> (B, m, n) on the MXU, f32 acc."""
  return jax.lax.dot_general(
      a, b, (((2,), (1,)), ((0,), (0,))),
      preferred_element_type=jnp.float32)


def _sobel_operands(batch, h, w):
  """Batch-broadcasted band matrices for a (batch, h, w) image stack."""
  s_h, c_h = _band_matrices(h)
  sb_h = jnp.broadcast_to(s_h, (batch, h, h))
  cb_h = jnp.broadcast_to(c_h, (batch, h, h))
  if w == h:
    return sb_h, cb_h, sb_h, cb_h
  s_w, c_w = _band_matrices(w)
  return (sb_h, cb_h,
          jnp.broadcast_to(s_w, (batch, w, w)),
          jnp.broadcast_to(c_w, (batch, w, w)))


def _sobel_mag(x, sb_h, cb_h, sb_w, cb_w):
  """|sobel_x| + |sobel_y| of a (B, H, W) stack, zero padding, separable form.

  gx = S_H @ x @ C_W   (vertical smooth, horizontal central difference)
  gy = C_H @ x @ S_W   (vertical central difference, horizontal smooth)
  All four matmuls are tiny batched MXU ops; no shifted-slice relayouts.
  """
  gx = _bmm(_bmm(sb_h, x), cb_w)
  gy = _bmm(_bmm(cb_h, x), sb_w)
  return jnp.abs(gx) + jnp.abs(gy)


# ----------------------------------- kernels -----------------------------------

def _l_grad_kernel(x1_ref, x2_ref, out_ref):
  """Default branch: sum |grad(img1_Y)| - |grad(img2_Y)| over the whole batch."""
  x1 = x1_ref[...].astype(jnp.float32)      # (B, H, W), channel 0 only
  x2 = x2_ref[...].astype(jnp.float32)
  b, h, w = x1.shape
  ops = _sobel_operands(b, h, w)            # hoisted once per step
  g1 = _sobel_mag(x1, *ops)
  g2 = _sobel_mag(x2, *ops)
  total = jnp.sum(jnp.abs(g1 - g2))
  out_ref[...] = jnp.full(out_ref.shape, total, dtype=out_ref.dtype)


def _l_grad_fused_kernel(rh_ref, rwt_ref, x1_ref, x2_ref, xf_ref, out_ref):
  """Fused branch: L1(|grad(fused_Y)|, max(|grad(resize(img1_Y))|, |grad(img2_Y)|))."""
  x1 = x1_ref[...].astype(jnp.float32)      # (B, H1, W1)
  b = x1.shape[0]
  s = x2_ref.shape[1]                       # 64

  # Bilinear resize (align_corners=False) folded into the kernel as two
  # interpolation matmuls on the MXU:  y1 = R_h @ x1 @ R_w^T   -> (B, 64, 64).
  rhb = jnp.broadcast_to(rh_ref[...], (b,) + rh_ref.shape)     # (B, 64, H1)
  rwtb = jnp.broadcast_to(rwt_ref[...], (b,) + rwt_ref.shape)  # (B, W1, 64)
  y1 = _bmm(_bmm(rhb, x1), rwtb)                               # (B, 64, 64)

  ops = _sobel_operands(b, s, s)            # hoisted once per step
  g1 = _sobel_mag(y1, *ops)
  g2 = _sobel_mag(x2_ref[...].astype(jnp.float32), *ops)
  joint = jnp.maximum(g1, g2)               # free g1/g2 before the third Sobel
  gf = _sobel_mag(xf_ref[...].astype(jnp.float32), *ops)
  total = jnp.sum(jnp.abs(gf - joint))
  out_ref[...] = jnp.full(out_ref.shape, total, dtype=out_ref.dtype)


# ----------------------------------- wrapper -----------------------------------

def _bilinear_matrix(out_size, in_size):
  """(out, in) 1-D interpolation matrix matching PyTorch F.interpolate
  (mode='bilinear', align_corners=False): half-pixel centers, edge clamp."""
  scale = in_size / out_size
  o = np.arange(out_size)
  src = np.maximum((o + 0.5) * scale - 0.5, 0.0)
  i0 = np.minimum(np.floor(src).astype(np.int64), in_size - 1)
  i1 = np.minimum(i0 + 1, in_size - 1)
  w1 = src - i0
  w0 = 1.0 - w1
  r = np.zeros((out_size, in_size), dtype=np.float64)
  r[o, i0] += w0
  r[o, i1] += w1
  return r.astype(np.float32)


def _y_channel_spec(shape):
  """Squeezed-channel BlockSpec: the whole batch's channel 0 in one block."""
  b, _, h, w = shape
  return pl.BlockSpec((b, None, h, w), lambda i: (0, 0, 0, 0))


_OUT_BLOCK = (8, 128)   # one lane-dense f32 block total; wrapper reads [0, 0]
_ARBITRARY = pltpu.CompilerParams(dimension_semantics=("arbitrary",))


def l_grad(img1, img2, image_fused=None):
  """JAX/Pallas equivalent of L_Grad.forward. Inputs are NCHW arrays."""
  if image_fused is None:
    b, _, h, w = img1.shape
    if img2.shape[0] != b or tuple(img2.shape[2:]) != (h, w):
      raise ValueError(f"img1/img2 incompatible: {img1.shape} vs {img2.shape}")
    out = pl.pallas_call(
        _l_grad_kernel,
        grid=(1,),
        in_specs=[_y_channel_spec(img1.shape), _y_channel_spec(img2.shape)],
        out_specs=pl.BlockSpec(_OUT_BLOCK, lambda i: (0, 0)),
        out_shape=jax.ShapeDtypeStruct(_OUT_BLOCK, jnp.float32),
        compiler_params=_ARBITRARY,
    )(img1, img2)
    return out[0, 0] / (b * h * w)

  # ---- fused branch: img1_Y resized to 64x64; img2 / fused already 64x64 ----
  s = 64
  b, _, h1, w1 = img1.shape
  if tuple(img2.shape[2:]) != (s, s) or tuple(image_fused.shape[2:]) != (s, s):
    raise ValueError("fused branch expects img2 / image_fused to be 64x64 spatially")
  rh = jnp.asarray(_bilinear_matrix(s, h1))          # (64, H1)
  rwt = jnp.asarray(_bilinear_matrix(s, w1).T)       # (W1, 64), pre-transposed
  out = pl.pallas_call(
      _l_grad_fused_kernel,
      grid=(1,),
      in_specs=[pl.BlockSpec((s, h1), lambda i: (0, 0)),
                pl.BlockSpec((w1, s), lambda i: (0, 0)),
                _y_channel_spec(img1.shape),
                _y_channel_spec(img2.shape),
                _y_channel_spec(image_fused.shape)],
      out_specs=pl.BlockSpec(_OUT_BLOCK, lambda i: (0, 0)),
      out_shape=jax.ShapeDtypeStruct(_OUT_BLOCK, jnp.float32),
      compiler_params=_ARBITRARY,
  )(rh, rwt, img1, img2, image_fused)
  return out[0, 0] / (b * s * s)


# ----------------------------- reference (plain JAX) -----------------------------

def _sobel_ref(y):
  """Direct 3x3 cross-correlation (like F.conv2d) on (B, H, W), zero padding."""
  h, w = y.shape[1], y.shape[2]
  yp = jnp.pad(y, ((0, 0), (1, 1), (1, 1)))

  def s(i, j):
    return yp[:, i:i + h, j:j + w]

  gx = (-s(0, 0) + s(0, 2) - 2.0 * s(1, 0) + 2.0 * s(1, 2) - s(2, 0) + s(2, 2))
  gy = (s(0, 0) + 2.0 * s(0, 1) + s(0, 2) - s(2, 0) - 2.0 * s(2, 1) - s(2, 2))
  return jnp.abs(gx) + jnp.abs(gy)


def _reference_l_grad(img1, img2, image_fused=None):
  hp = jax.lax.Precision.HIGHEST
  if image_fused is None:
    g1 = _sobel_ref(img1[:, 0].astype(jnp.float32))
    g2 = _sobel_ref(img2[:, 0].astype(jnp.float32))
    return jnp.mean(jnp.abs(g1 - g2))
  s = 64
  rh = jnp.asarray(_bilinear_matrix(s, img1.shape[2]))
  rw = jnp.asarray(_bilinear_matrix(s, img1.shape[3]))
  y1 = jnp.einsum('oh,bhw->bow', rh, img1[:, 0].astype(jnp.float32), precision=hp)
  y1 = jnp.einsum('bow,pw->bop', y1, rw, precision=hp)
  g1 = _sobel_ref(y1)
  g2 = _sobel_ref(img2[:, 0].astype(jnp.float32))
  gf = _sobel_ref(image_fused[:, 0].astype(jnp.float32))
  return jnp.mean(jnp.abs(gf - jnp.maximum(g1, g2)))


if __name__ == "__main__":
  key = jax.random.PRNGKey(0)
  k1, k2, k3, k4, k5 = jax.random.split(key, 5)

  # Tolerance leaves headroom for MXU f32 rounding; real logic bugs (boundary,
  # band orientation, resize weights) deviate by >>1%.
  rtol, atol = 5e-3, 1e-4

  # ---- default branch: img1, img2 of shape (2, 4, 16, 16) ----
  img1 = jax.random.uniform(k1, (2, 4, 16, 16), dtype=jnp.float32)
  img2 = jax.random.uniform(k2, (2, 4, 16, 16), dtype=jnp.float32)
  loss = l_grad(img1, img2)
  jax.block_until_ready(loss)
  ref = _reference_l_grad(img1, img2)
  assert jnp.allclose(loss, ref, rtol=rtol, atol=atol), (loss, ref)

  # ---- fused branch: img1 (2,4,16,16); img2 / fused are 64x64 spatially ----
  img1b = jax.random.uniform(k3, (2, 4, 16, 16), dtype=jnp.float32)
  img2b = jax.random.uniform(k4, (2, 4, 64, 64), dtype=jnp.float32)
  fused = jax.random.uniform(k5, (2, 4, 64, 64), dtype=jnp.float32)
  loss_f = l_grad(img1b, img2b, fused)
  jax.block_until_ready(loss_f)
  ref_f = _reference_l_grad(img1b, img2b, fused)
  assert jnp.allclose(loss_f, ref_f, rtol=rtol, atol=atol), (loss_f, ref_f)

  print("KERNEL_OK")
</pallas_src>

<mosaic_0001>
module attributes {stable_mosaic.version = 11 : i64} {
  func.func @_l_grad_kernel(%arg0: i32, %arg1: memref<2x1x16x16xf32, #tpu.memory_space<vmem>>, %arg2: memref<2x1x16x16xf32, #tpu.memory_space<vmem>>, %arg3: memref<8x128xf32, #tpu.memory_space<vmem>>) attributes {dimension_semantics = [#tpu.dimension_semantics<arbitrary>], iteration_bounds = array<i64: 1>, scalar_prefetch = 0 : i64, scratch_operands = 0 : i64, tpu.core_type = #tpu.core_type<tc>, window_params = [{transform_indices = @transform_0, window_bounds = array<i64: 2, 1, 16, 16>}, {transform_indices = @transform_1, window_bounds = array<i64: 2, 1, 16, 16>}, {pipeline_mode = #tpu.pipeline_mode<synchronous>, transform_indices = @transform_2, window_bounds = array<i64: 8, 128>}]} {
    %c0 = arith.constant 0 : index
    %c0_0 = arith.constant 0 : index
    %c0_1 = arith.constant 0 : index
    %c0_2 = arith.constant 0 : index
    %0 = vector.load %arg1[%c0, %c0_0, %c0_1, %c0_2] : memref<2x1x16x16xf32, #tpu.memory_space<vmem>>, vector<2x1x16x16xf32>
    %1 = vector.shape_cast %0 : vector<2x1x16x16xf32> to vector<2x16x16xf32>
    %c0_3 = arith.constant 0 : index
    %c0_4 = arith.constant 0 : index
    %c0_5 = arith.constant 0 : index
    %c0_6 = arith.constant 0 : index
    %2 = vector.load %arg2[%c0_3, %c0_4, %c0_5, %c0_6] : memref<2x1x16x16xf32, #tpu.memory_space<vmem>>, vector<2x1x16x16xf32>
    %3 = vector.shape_cast %2 : vector<2x1x16x16xf32> to vector<2x16x16xf32>
    %4 = tpu.iota {dimensions = array<i32: 0>} : vector<16x16xi32>
    %5 = tpu.iota {dimensions = array<i32: 1>} : vector<16x16xi32>
    %6 = arith.subi %4, %5 : vector<16x16xi32>
    %c0_i32 = arith.constant 0 : i32
    %7 = vector.broadcast %c0_i32 : i32 to vector<16x16xi32>
    %8 = arith.cmpi eq, %6, %7 : vector<16x16xi32>
    %cst = arith.constant 2.000000e+00 : f32
    %cst_7 = arith.constant 0.000000e+00 : f32
    %9 = vector.broadcast %cst : f32 to vector<16x16xf32>
    %10 = vector.broadcast %cst_7 : f32 to vector<16x16xf32>
    %11 = arith.select %8, %9, %10 : vector<16x16xi1>, vector<16x16xf32>
    %12 = math.absi %6 : vector<16x16xi32>
    %c1_i32 = arith.constant 1 : i32
    %13 = vector.broadcast %c1_i32 : i32 to vector<16x16xi32>
    %14 = arith.cmpi eq, %12, %13 : vector<16x16xi32>
    %cst_8 = arith.constant 1.000000e+00 : f32
    %cst_9 = arith.constant 0.000000e+00 : f32
    %15 = vector.broadcast %cst_8 : f32 to vector<16x16xf32>
    %16 = vector.broadcast %cst_9 : f32 to vector<16x16xf32>
    %17 = arith.select %14, %15, %16 : vector<16x16xi1>, vector<16x16xf32>
    %18 = arith.addf %11, %17 : vector<16x16xf32>
    %c1_i32_10 = arith.constant 1 : i32
    %19 = vector.broadcast %c1_i32_10 : i32 to vector<16x16xi32>
    %20 = arith.cmpi eq, %6, %19 : vector<16x16xi32>
    %cst_11 = arith.constant 1.000000e+00 : f32
    %cst_12 = arith.constant 0.000000e+00 : f32
    %21 = vector.broadcast %cst_11 : f32 to vector<16x16xf32>
    %22 = vector.broadcast %cst_12 : f32 to vector<16x16xf32>
    %23 = arith.select %20, %21, %22 : vector<16x16xi1>, vector<16x16xf32>
    %c-1_i32 = arith.constant -1 : i32
    %24 = vector.broadcast %c-1_i32 : i32 to vector<16x16xi32>
    %25 = arith.cmpi eq, %6, %24 : vector<16x16xi32>
    %cst_13 = arith.constant 1.000000e+00 : f32
    %cst_14 = arith.constant 0.000000e+00 : f32
    %26 = vector.broadcast %cst_13 : f32 to vector<16x16xf32>
    %27 = vector.broadcast %cst_14 : f32 to vector<16x16xf32>
    %28 = arith.select %25, %26, %27 : vector<16x16xi1>, vector<16x16xf32>
    %29 = arith.subf %23, %28 : vector<16x16xf32>
    %30 = vector.shape_cast %18 : vector<16x16xf32> to vector<1x16x16xf32>
    %31 = vector.broadcast %30 : vector<1x16x16xf32> to vector<2x16x16xf32>
    %32 = vector.shape_cast %29 : vector<16x16xf32> to vector<1x16x16xf32>
    %33 = vector.broadcast %32 : vector<1x16x16xf32> to vector<2x16x16xf32>
    %cst_15 = arith.constant dense<0.000000e+00> : vector<2x16x16xf32>
    %34 = tpu.matmul %31, %1, %cst_15 {dimension_numbers = #tpu.dot_dimension_numbers<[2], [1], [1], [2], [0, 0, 0, 1, 1, 2], [0], [0]>} : vector<2x16x16xf32>, vector<2x16x16xf32>, vector<2x16x16xf32> -> vector<2x16x16xf32>
    %cst_16 = arith.constant dense<0.000000e+00> : vector<2x16x16xf32>
    %35 = tpu.matmul %34, %33, %cst_16 {dimension_numbers = #tpu.dot_dimension_numbers<[2], [1], [1], [2], [0, 0, 0, 1, 1, 2], [0], [0]>} : vector<2x16x16xf32>, vector<2x16x16xf32>, vector<2x16x16xf32> -> vector<2x16x16xf32>
    %cst_17 = arith.constant dense<0.000000e+00> : vector<2x16x16xf32>
    %36 = tpu.matmul %33, %1, %cst_17 {dimension_numbers = #tpu.dot_dimension_numbers<[2], [1], [1], [2], [0, 0, 0, 1, 1, 2], [0], [0]>} : vector<2x16x16xf32>, vector<2x16x16xf32>, vector<2x16x16xf32> -> vector<2x16x16xf32>
    %cst_18 = arith.constant dense<0.000000e+00> : vector<2x16x16xf32>
    %37 = tpu.matmul %36, %31, %cst_18 {dimension_numbers = #tpu.dot_dimension_numbers<[2], [1], [1], [2], [0, 0, 0, 1, 1, 2], [0], [0]>} : vector<2x16x16xf32>, vector<2x16x16xf32>, vector<2x16x16xf32> -> vector<2x16x16xf32>
    %38 = math.absf %35 : vector<2x16x16xf32>
    %39 = math.absf %37 : vector<2x16x16xf32>
    %40 = arith.addf %38, %39 : vector<2x16x16xf32>
    %cst_19 = arith.constant dense<0.000000e+00> : vector<2x16x16xf32>
    %41 = tpu.matmul %31, %3, %cst_19 {dimension_numbers = #tpu.dot_dimension_numbers<[2], [1], [1], [2], [0, 0, 0, 1, 1, 2], [0], [0]>} : vector<2x16x16xf32>, vector<2x16x16xf32>, vector<2x16x16xf32> -> vector<2x16x16xf32>
    %cst_20 = arith.constant dense<0.000000e+00> : vector<2x16x16xf32>
    %42 = tpu.matmul %41, %33, %cst_20 {dimension_numbers = #tpu.dot_dimension_numbers<[2], [1], [1], [2], [0, 0, 0, 1, 1, 2], [0], [0]>} : vector<2x16x16xf32>, vector<2x16x16xf32>, vector<2x16x16xf32> -> vector<2x16x16xf32>
    %cst_21 = arith.constant dense<0.000000e+00> : vector<2x16x16xf32>
    %43 = tpu.matmul %33, %3, %cst_21 {dimension_numbers = #tpu.dot_dimension_numbers<[2], [1], [1], [2], [0, 0, 0, 1, 1, 2], [0], [0]>} : vector<2x16x16xf32>, vector<2x16x16xf32>, vector<2x16x16xf32> -> vector<2x16x16xf32>
    %cst_22 = arith.constant dense<0.000000e+00> : vector<2x16x16xf32>
    %44 = tpu.matmul %43, %31, %cst_22 {dimension_numbers = #tpu.dot_dimension_numbers<[2], [1], [1], [2], [0, 0, 0, 1, 1, 2], [0], [0]>} : vector<2x16x16xf32>, vector<2x16x16xf32>, vector<2x16x16xf32> -> vector<2x16x16xf32>
    %45 = math.absf %42 : vector<2x16x16xf32>
    %46 = math.absf %44 : vector<2x16x16xf32>
    %47 = arith.addf %45, %46 : vector<2x16x16xf32>
    %48 = arith.subf %40, %47 : vector<2x16x16xf32>
    %49 = math.absf %48 : vector<2x16x16xf32>
    %50 = vector.shape_cast %49 : vector<2x16x16xf32> to vector<1x2x16x16xf32>
    %cst_23 = arith.constant dense<0.000000e+00> : vector<1xf32>
    %51 = vector.multi_reduction <add>, %50, %cst_23 [1, 2, 3] : vector<1x2x16x16xf32> to vector<1xf32>
    %52 = vector.shape_cast %51 : vector<1xf32> to vector<1x1x1x1xf32>
    %53 = vector.extract %52[0, 0, 0, 0] : f32 from vector<1x1x1x1xf32>
    %54 = vector.broadcast %53 : f32 to vector<8x128xf32>
    %c0_24 = arith.constant 0 : index
    %c0_25 = arith.constant 0 : index
    %55 = vector.load %arg3[%c0_24, %c0_25] : memref<8x128xf32, #tpu.memory_space<vmem>>, vector<8x128xf32>
    tpu.vector_store %arg3[%c0_24, %c0_25], %54 {strides = array<i32>} : memref<8x128xf32, #tpu.memory_space<vmem>>, vector<8x128xf32>,
    return
  }
  func.func @transform_0(%arg0: i32) -> (i32, i32, i32, i32) {
    %c0_i32 = arith.constant 0 : i32
    %c0_i32_0 = arith.constant 0 : i32
    %c0_i32_1 = arith.constant 0 : i32
    %c0_i32_2 = arith.constant 0 : i32
    %c0_i32_3 = arith.constant 0 : i32
    return %c0_i32, %c0_i32_0, %c0_i32_1, %c0_i32_2 : i32, i32, i32, i32
  }
  func.func @transform_1(%arg0: i32) -> (i32, i32, i32, i32) {
    %c0_i32 = arith.constant 0 : i32
    %c0_i32_0 = arith.constant 0 : i32
    %c0_i32_1 = arith.constant 0 : i32
    %c0_i32_2 = arith.constant 0 : i32
    %c0_i32_3 = arith.constant 0 : i32
    return %c0_i32, %c0_i32_0, %c0_i32_1, %c0_i32_2 : i32, i32, i32, i32
  }
  func.func @transform_2(%arg0: i32) -> (i32, i32) {
    %c0_i32 = arith.constant 0 : i32
    %c0_i32_0 = arith.constant 0 : i32
    %c0_i32_1 = arith.constant 0 : i32
    return %c0_i32, %c0_i32_0 : i32, i32
  }
}

</mosaic_0001>

<bundles_post_ra>
// kernel: tpu_custom_call.1
= control target key start
LH: loop header
LB: loop body
LE: loop exit
PB: predicated region body
PF: predicated region fallthrough
CT: control target
= control target key end

     0   :  { %7 = vsyncpa [#allocation3], 0  ;;  %s809_s0 = inlined_call_operand.hbm [shape: f32[2,4,16,16], index: 0, kind: input, shape index: {}]   ;;  %s810_s1 = inlined_call_operand.hbm [shape: f32[2,4,16,16], index: 1, kind: input, shape index: {}]   ;;  %s811_s2 = inlined_call_operand.hbm [shape: f32[8,128], index: 2, kind: output, shape index: {}]  }
   0x1   :  { %8 = vsyncpa [#allocation6], 0 }
   0x2   :  { %9 = vsyncpa [#allocation4], 0 }
   0x3   :  { %s18_s9 = sld [smem:[#allocation0]]   ;;  %s26_s12 = sshll.u32 %s809_s0, 4  ;;  %s27_s12 = int_to_ptr.hbm [resolvable:$true] %s26_s12 }
   0x4   :  { %s718_s13 = smov [#allocation2]   ;;  %s719_s15 = smov 1024  }
   0x5   :  { %s28_s14 = sshll.u32 %s718_s13, 4  ;;  %35 = sst [smem:[#allocation9]] %s719_s15  ;;  %s29_s14 = int_to_ptr.vmem [resolvable:$true] %s28_s14 }
   0x6   :  { %s720_s16 = smov 256   ;;  %s721_s18 = smov 2  }
   0x7   :  { %37 = sst [smem:[#allocation9 + $0x1]] %s720_s16  ;;  %s722_s20 = smov 128  }
   0x8   :  { %39 = sst [smem:[#allocation9 + $0x2]] %s721_s18  ;;  %s723_s21 = smov 8  }
   0x9   :  { %s632_s17 = sshll.u32 %s18_s9, 26  ;;  %41 = sst [smem:[#allocation9 + $0x3]] %s722_s20 }
   0xa   :  { %s633_s19 = sadd.s32 134217728, %s632_s17  ;;  %43 = sst [smem:[#allocation9 + $0x4]] %s722_s20 }
   0xb   :  { %45 = sst [smem:[#allocation9 + $0x5]] %s723_s21  ;;  %s724_s22 = smov [#allocation3]  }
   0xc   :  { %s725_s23 = smov [#allocation8]  }
   0xd   :  { %47 = dma.general %s27_s12, 512, %s29_s14, %s724_s22, %s725_s23, [#allocation9], %s633_s19, 0  }
   0xe   :  { %s56_s0 = sld [smem:[#allocation0]]   ;;  %s64_s26 = sshll.u32 %s810_s1, 4  ;;  %s65_s26 = int_to_ptr.hbm [resolvable:$true] %s64_s26 }
   0xf   :  { %s726_s27 = smov [#allocation5]   ;;  %s727_s29 = smov 1024  }
  0x10   :  { %s66_s28 = sshll.u32 %s726_s27, 4  ;;  %73 = sst [smem:[#allocation11]] %s727_s29  ;;  %s67_s28 = int_to_ptr.vmem [resolvable:$true] %s66_s28 }
  0x11   :  { %s728_s30 = smov 256   ;;  %s729_s4 = smov 2  }
  0x12   :  { %75 = sst [smem:[#allocation11 + $0x1]] %s728_s30  ;;  %s730_s6 = smov 128  }
  0x13   :  { %77 = sst [smem:[#allocation11 + $0x2]] %s729_s4  ;;  %s731_s7 = smov 8  }
  0x14   :  { %s634_s3 = sshll.u32 %s56_s0, 26  ;;  %79 = sst [smem:[#allocation11 + $0x3]] %s730_s6 }
  0x15   :  { %s635_s5 = sadd.s32 134217728, %s634_s3  ;;  %81 = sst [smem:[#allocation11 + $0x4]] %s730_s6 }
  0x16   :  { %83 = sst [smem:[#allocation11 + $0x5]] %s731_s7  ;;  %s732_s8 = smov [#allocation6]  }
  0x17   :  { %s733_s9 = smov [#allocation10]  }
  0x18   :  { %85 = dma.general %s65_s26, 512, %s67_s28, %s732_s8, %s733_s9, [#allocation11], %s635_s5, 0  }
  0x19   :  { %712 = dma.done.wait [#allocation3], 512  }
  0x1a   :  { %713 = vsyncadd [#allocation3], 4294966784 }
  0x1b   :  { %714 = dma.done.wait [#allocation6], 512  }
  0x1c   :  { %715 = vsyncadd [#allocation6], 4294966784  ;;  %v102_v0 = vlaneseq  ;;  %v95_v7 = vld [vmem:[#allocation2 + $0x8] sm:$0xff]  ;;  %v97_v8 = vld [vmem:[#allocation2 + $0x18] sm:$0xff]  ;;  %v734_v11 = vmov 0.0   ;;  %vm135_vm4 = vcmask 130048  }
  0x1d   :  { %v94_v9 = vld [vmem:[#allocation2] sm:$0xff]  ;;  %156 = vmatpush.msra.mxu0 %v95_v7  ;;  %179 = vmatpush.msra.mxu1 %v97_v8  ;;  %v96_v10 = vld [vmem:[#allocation2 + $0x10] sm:$0xff]  ;;  %v99_v19 = vld [vmem:[#allocation5 + $0x8] sm:$0xff]  ;;  %s735_s1 = smov [#allocation7]   ;;  %s621_s13 = sshll.u32 %s811_s2, 4  ;;  %s622_s13 = int_to_ptr.hbm [resolvable:$true] %s621_s13 }
  0x1e   :  { %v103_v1 = vshrl.u32 %v102_v0, 7  ;;  %v106_v2 = vand.u32 127, %v102_v0  ;;  %v101_v20 = vld [vmem:[#allocation5 + $0x18] sm:$0xff]  ;;  %v98_v27 = vld [vmem:[#allocation5] sm:$0xff]  ;;  %v100_v28 = vld [vmem:[#allocation5 + $0x10] sm:$0xff]  ;;  %s619_s10 = sshll.u32 %s735_s1, 4  ;;  %s620_s10 = int_to_ptr.vmem [resolvable:$true] %s619_s10 }
  0x1f   :  { %157 = vmatpush.msra.mxu0 %v94_v9  ;;  %180 = vmatpush.msra.mxu1 %v96_v10 }
  0x20   :  { %v107_v3 = vsub.s32 %v103_v1, %v106_v2  ;;  %v104_v4 = vadd.s32 8, %v103_v1 }
  0x21   :  { %266 = vmatpush.msrb.mxu0 %v95_v7  ;;  %289 = vmatpush.msrb.mxu1 %v97_v8 }
  0x22   :  { %vm109_vm0 = vcmp.eq.s32.totalorder %v107_v3, 0  ;;  %vm113_vm1 = vcmp.lt.s32.totalorder %v107_v3, 0  ;;  %v114_v5 = vsub.s32 0, %v107_v3  ;;  %v108_v6 = vsub.s32 %v104_v4, %v106_v2 }
  0x23   :  { %v111_v12 = vsel %vm109_vm0, 2.0, %v734_v11  ;;  %vm125_vm5 = vcmp.eq.s32.totalorder %v107_v3, 1  ;;  %vm129_vm6 = vcmp.eq.s32.totalorder %v107_v3, 4294967295  ;;  %267 = vmatpush.msrb.mxu0 %v94_v9  ;;  %290 = vmatpush.msrb.mxu1 %v96_v10 }
  0x24   :  { %v115_v13 = vsel %vm113_vm1, %v114_v5, %v107_v3  ;;  %vm116_vm2 = vcmp.lt.s32.totalorder %v108_v6, 0  ;;  %v117_v14 = vsub.s32 0, %v108_v6  ;;  %vm110_vm7 = vcmp.eq.s32.totalorder %v108_v6, 0 }
  0x25   :  { %vm119_vm3 = vcmp.eq.s32.totalorder %v115_v13, 1  ;;  %vm126_vm8 = vcmp.eq.s32.totalorder %v108_v6, 1  ;;  %vm130_vm10 = vcmp.eq.s32.totalorder %v108_v6, 4294967295  ;;  %v127_v22 = vsel %vm125_vm5, 1.0, %v734_v11 }
  0x26   :  { %v121_v15 = vsel %vm119_vm3, 1.0, %v734_v11  ;;  %v118_v16 = vsel %vm116_vm2, %v117_v14, %v108_v6  ;;  %v128_v18 = vsel %vm126_vm8, 1.0, %v734_v11  ;;  %v132_v21 = vsel %vm130_vm10, 1.0, %v734_v11 }
  0x27   :  { %v757_v17 = vadd.f32 %v121_v15, %v111_v12  ;;  %vm120_vm9 = vcmp.eq.s32.totalorder %v118_v16, 1  ;;  %v131_v23 = vsel %vm129_vm6, 1.0, %v734_v11  ;;  %v112_v24 = vsel %vm110_vm7, 2.0, %v734_v11 }
  0x28   :  { %v122_v25 = vsel %vm120_vm9, 1.0, %v734_v11  ;;  %v134_v26 = vsub.f32 %v128_v18, %v132_v21  ;;  %v133_v29 = vsub.f32 %v127_v22, %v131_v23 }
  0x29   :  { %636 = vmatmul.msk.f32.vlgmr.msra.gmra.mxu0 %vm135_vm4, %v757_v17  ;;  %638 = vmatmul.msk.f32.vlgmr.msra.gmra.mxu1 %vm135_vm4, %v757_v17  ;;  %v124_v30 = vadd.f32 %v122_v25, %v112_v24 }
  0x2a   :  { %382 = vmatpush.msra.mxu0 %v99_v19  ;;  %405 = vmatpush.msra.mxu1 %v101_v20 }
  0x2b   :  { %208 = vmatpush.msra.mxu2 %v134_v26  ;;  %237 = vmatpush.msra.mxu3 %v134_v26 }
  0x2c   :  { %383 = vmatpush.msra.mxu0 %v98_v27  ;;  %406 = vmatpush.msra.mxu1 %v100_v28 }
  0x2d   :  { %209 = vmatpush.msra.mxu2 %v133_v29  ;;  %238 = vmatpush.msra.mxu3 %v133_v29 }
  0x2f   :  { %318 = vmatpush.msrb.mxu2 %v124_v30  ;;  %347 = vmatpush.msrb.mxu3 %v124_v30 }
  0x31   :  { %637 = vmatmul.msk.f32.gmra.mxu0 %vm135_vm4, %v124_v30  ;;  %639 = vmatmul.msk.f32.gmra.mxu1 %vm135_vm4, %v124_v30 }
  0x32   :  { %319 = vmatpush.msrb.mxu2 %v757_v17  ;;  %348 = vmatpush.msrb.mxu3 %v757_v17 }
  0x39   :  { %644 = vmatmul.msk.f32.vlgmr.msrb.gmra.mxu0 %vm135_vm4, %v133_v29  ;;  %646 = vmatmul.msk.f32.vlgmr.msrb.gmra.mxu1 %vm135_vm4, %v133_v29 }
  0x3a   :  { %486 = vmatpush.msrb.mxu0 %v99_v19  ;;  %509 = vmatpush.msrb.mxu1 %v101_v20 }
  0x3c   :  { %487 = vmatpush.msrb.mxu0 %v98_v27  ;;  %510 = vmatpush.msrb.mxu1 %v100_v28 }
  0x41   :  { %645 = vmatmul.msk.f32.gmra.mxu0 %vm135_vm4, %v134_v26  ;;  %647 = vmatmul.msk.f32.gmra.mxu1 %vm135_vm4, %v134_v26 }
  0x49   :  { %652 = vmatmul.msk.f32.vlgmr.msra.gmra.mxu0 %vm135_vm4, %v757_v17  ;;  %654 = vmatmul.msk.f32.vlgmr.msra.gmra.mxu1 %vm135_vm4, %v757_v17 }
  0x51   :  { %653 = vmatmul.msk.f32.gmra.mxu0 %vm135_vm4, %v124_v30  ;;  %655 = vmatmul.msk.f32.gmra.mxu1 %vm135_vm4, %v124_v30 }
  0x59   :  { %660 = vmatmul.msk.f32.vlgmr.msrb.gmra.mxu0 %vm135_vm4, %v133_v29  ;;  %662 = vmatmul.msk.f32.vlgmr.msrb.gmra.mxu1 %vm135_vm4, %v133_v29 }
  0x61   :  { %661 = vmatmul.msk.f32.gmra.mxu0 %vm135_vm4, %v134_v26  ;;  %663 = vmatmul.msk.f32.gmra.mxu1 %vm135_vm4, %v134_v26 }
  0xa6   :  { %v159_v31 = vpop.f32.mrf.mxu0  ;;  %v182_v32 = vpop.f32.mrf.mxu1 }
  0xa7   :  { %640 = vmatmul.msk.f32.vlgmr.msra.gmra.mxu2 %vm135_vm4, %v159_v31  ;;  %642 = vmatmul.msk.f32.vlgmr.msra.gmra.mxu3 %vm135_vm4, %v182_v32 }
  0xa8   :  { %434 = vmatpush.msra.mxu2 %v134_v26  ;;  %463 = vmatpush.msra.mxu3 %v134_v26 }
  0xaa   :  { %435 = vmatpush.msra.mxu2 %v133_v29  ;;  %464 = vmatpush.msra.mxu3 %v133_v29 }
  0xae   :  { %v162_v33 = vpop.f32.mrf.mxu0  ;;  %v185_v34 = vpop.f32.mrf.mxu1 }
  0xaf   :  { %641 = vmatmul.msk.f32.gmra.mxu2 %vm135_vm4, %v162_v33  ;;  %643 = vmatmul.msk.f32.gmra.mxu3 %vm135_vm4, %v185_v34 }
  0xb6   :  { %v269_v35 = vpop.f32.mrf.mxu0  ;;  %v292_v36 = vpop.f32.mrf.mxu1 }
  0xb7   :  { %648 = vmatmul.msk.f32.vlgmr.msrb.gmra.mxu2 %vm135_vm4, %v269_v35  ;;  %650 = vmatmul.msk.f32.vlgmr.msrb.gmra.mxu3 %vm135_vm4, %v292_v36 }
  0xb8   :  { %538 = vmatpush.msrb.mxu2 %v124_v30  ;;  %567 = vmatpush.msrb.mxu3 %v124_v30 }
  0xba   :  { %539 = vmatpush.msrb.mxu2 %v757_v17  ;;  %568 = vmatpush.msrb.mxu3 %v757_v17 }
  0xbe   :  { %v272_v37 = vpop.f32.mrf.mxu0  ;;  %v295_v38 = vpop.f32.mrf.mxu1 }
  0xbf   :  { %649 = vmatmul.msk.f32.gmra.mxu2 %vm135_vm4, %v272_v37  ;;  %651 = vmatmul.msk.f32.gmra.mxu3 %vm135_vm4, %v295_v38 }
  0xc6   :  { %v385_v39 = vpop.f32.mrf.mxu0  ;;  %v408_v40 = vpop.f32.mrf.mxu1 }
  0xc7   :  { %656 = vmatmul.msk.f32.vlgmr.msra.gmra.mxu2 %vm135_vm4, %v385_v39  ;;  %658 = vmatmul.msk.f32.vlgmr.msra.gmra.mxu3 %vm135_vm4, %v408_v40 }
  0xce   :  { %v388_v41 = vpop.f32.mrf.mxu0  ;;  %v411_v42 = vpop.f32.mrf.mxu1 }
  0xcf   :  { %657 = vmatmul.msk.f32.gmra.mxu2 %vm135_vm4, %v388_v41  ;;  %659 = vmatmul.msk.f32.gmra.mxu3 %vm135_vm4, %v411_v42 }
  0xd6   :  { %v489_v43 = vpop.f32.mrf.mxu0  ;;  %v512_v44 = vpop.f32.mrf.mxu1 }
  0xd7   :  { %664 = vmatmul.msk.f32.vlgmr.msrb.gmra.mxu2 %vm135_vm4, %v489_v43  ;;  %666 = vmatmul.msk.f32.vlgmr.msrb.gmra.mxu3 %vm135_vm4, %v512_v44 }
  0xde   :  { %v492_v45 = vpop.f32.mrf.mxu0  ;;  %v515_v46 = vpop.f32.mrf.mxu1 }
  0xdf   :  { %665 = vmatmul.msk.f32.gmra.mxu2 %vm135_vm4, %v492_v45  ;;  %667 = vmatmul.msk.f32.gmra.mxu3 %vm135_vm4, %v515_v46 }
 0x12a   :  { %v211_v47 = vpop.f32.mrf.mxu2  ;;  %v240_v48 = vpop.f32.mrf.mxu3 }
 0x12b   :  { %v356_v2 = vand.u32 2147483647, %v211_v47  ;;  %v358_v5 = vand.u32 2147483647, %v240_v48 }
 0x132   :  { %v214_v49 = vpop.f32.mrf.mxu2  ;;  %v243_v50 = vpop.f32.mrf.mxu3 }
 0x133   :  { %v357_v10 = vand.u32 2147483647, %v214_v49  ;;  %v359_v11 = vand.u32 2147483647, %v243_v50 }
 0x13a   :  { %v321_v51 = vpop.f32.mrf.mxu2  ;;  %v350_v52 = vpop.f32.mrf.mxu3 }
 0x13b   :  { %v360_v62 = vand.u32 2147483647, %v321_v51  ;;  %v362_v1 = vand.u32 2147483647, %v350_v52 }
 0x13d   :  { %v364_v7 = vadd.f32 %v360_v62, %v356_v2  ;;  %v366_v12 = vadd.f32 %v362_v1, %v358_v5 }
 0x142   :  { %v324_v53 = vpop.f32.mrf.mxu2  ;;  %v353_v54 = vpop.f32.mrf.mxu3 }
 0x143   :  { %v361_v6 = vand.u32 2147483647, %v324_v53  ;;  %v363_v8 = vand.u32 2147483647, %v353_v54 }
 0x145   :  { %v365_v20 = vadd.f32 %v361_v6, %v357_v10  ;;  %v367_v21 = vadd.f32 %v363_v8, %v359_v11 }
 0x14a   :  { %v437_v55 = vpop.f32.mrf.mxu2  ;;  %v466_v56 = vpop.f32.mrf.mxu3 }
 0x14b   :  { %v576_v63 = vand.u32 2147483647, %v437_v55  ;;  %v578_v3 = vand.u32 2147483647, %v466_v56 }
 0x152   :  { %v440_v57 = vpop.f32.mrf.mxu2  ;;  %v469_v58 = vpop.f32.mrf.mxu3 }
 0x153   :  { %v577_v13 = vand.u32 2147483647, %v440_v57  ;;  %v579_v16 = vand.u32 2147483647, %v469_v58 }
 0x15a   :  { %v541_v59 = vpop.f32.mrf.mxu2  ;;  %v570_v60 = vpop.f32.mrf.mxu3 }
 0x15b   :  { %v580_v61 = vand.u32 2147483647, %v541_v59  ;;  %v582_v0 = vand.u32 2147483647, %v570_v60 }
 0x15d   :  { %v584_v4 = vadd.f32 %v580_v61, %v576_v63  ;;  %v586_v9 = vadd.f32 %v582_v0, %v578_v3 }
 0x15f   :  { %v588_v17 = vsub.f32 %v364_v7, %v584_v4  ;;  %v590_v22 = vsub.f32 %v366_v12, %v586_v9 }
 0x161   :  { %v592_v25 = vand.u32 2147483647, %v588_v17  ;;  %v594_v29 = vand.u32 2147483647, %v590_v22 }
 0x162   :  { %v544_v14 = vpop.f32.mrf.mxu2  ;;  %v573_v15 = vpop.f32.mrf.mxu3 }
 0x163   :  { %v581_v18 = vand.u32 2147483647, %v544_v14  ;;  %v583_v19 = vand.u32 2147483647, %v573_v15  ;;  %v596_v31 = vsel %vm135_vm4, %v592_v25, 0.0  ;;  %v599_v34 = vsel %vm135_vm4, %v594_v29, 0.0 }
 0x165   :  { %v585_v23 = vadd.f32 %v581_v18, %v577_v13  ;;  %v587_v24 = vadd.f32 %v583_v19, %v579_v16 }
 0x167   :  { %v589_v26 = vsub.f32 %v365_v20, %v585_v23  ;;  %v591_v27 = vsub.f32 %v367_v21, %v587_v24 }
 0x169   :  { %v593_v28 = vand.u32 2147483647, %v589_v26  ;;  %v595_v30 = vand.u32 2147483647, %v591_v27 }
 0x16b   :  { %v597_v32 = vsel %vm135_vm4, %v593_v28, 0.0  ;;  %v601_v36 = vsel %vm135_vm4, %v595_v30, 0.0 }
 0x16c   :  { %v598_v33 = vadd.f32 %v597_v32, %v596_v31 }
 0x16e   :  { %v600_v35 = vadd.f32 %v599_v34, %v598_v33 }
 0x170   :  { %v602_v37 = vadd.f32 %v601_v36, %v600_v35 }
 0x172   :  { %603 = vadd.xlane.f32.xlu0 %v602_v37 }
 0x1e5   :  { %v604_v38 = vpop.xlane.xlu0 %603 }
 0x1e6   :  { %v605_v39 = vrot.slane %v604_v38, 4 }
 0x1e8   :  { %v606_v40 = vadd.f32 %v605_v39, %v604_v38 }
 0x1ea   :  { %v607_v41 = vrot.slane %v606_v40, 2 }
 0x1ec   :  { %v608_v42 = vadd.f32 %v607_v41, %v606_v40 }
 0x1ee   :  { %v609_v43 = vrot.slane %v608_v42, 1 }
 0x1f0   :  { %v610_v44 = vadd.f32 %v609_v43, %v608_v42 }
 0x1f2   :  { %668 = vpush %v610_v44 }
 0x223   :  { %s669_s14 = spop %668 }
 0x224   :  { %v612_v45 = vstv %s669_s14 }
 0x225   :  { %613 = vst [vmem:[#allocation7] sm:$0xff] %v612_v45 }
 0x226   :  { %624 = dma.vmem_to_hbm [thread:$0]  %s620_s10, 128, %s622_s13, [#allocation4]  }
 0x227   :  { %716 = dma.done.wait [#allocation4], 128  }
 0x228   :  { %717 = vsyncadd [#allocation4], 4294967168 }
 0x229   :  { %629 = vsyncpa [#allocation3], 1 }
 0x22a   :  { %630 = vsyncpa [#allocation6], 1 }
 0x22b   :  { %631 = vsyncpa [#allocation4], 1 }

</bundles_post_ra>
